<compile_context>
chip_gen: v5e
topology: v5e:2x2
jax: 0.10.0
libtpu: 0.0.40
codegen_flags: <defaults>
</compile_context>

<pallas_src>
import functools

import jax
import jax.numpy as jnp
from jax import lax
from jax.experimental import pallas as pl
from jax.experimental.pallas import tpu as pltpu

BN_EPS = 1e-5


def special_block_kernel(x_ref, ws_ref, wl_ref, wm_ref, wh_ref, sc_ref, sh_ref,
                         o_ref, pool_scr, *, n_batch, seq_len, c_out):
    """One grid step = `n_batch` batch elements, flattened into rows.

    x_ref    : (n_batch*L, Cin)         channels-last activations, f32
    ws_ref   : (3, Cin, Cout)           stem conv taps           (MXU dtype)
    wl_ref   : (3, Cout, Cout)          low-branch conv taps     (MXU dtype)
    wm_ref   : (5, Cout, Cout)          mid-branch conv taps     (MXU dtype)
    wh_ref   : (7, Cout, Cout)          high-branch conv taps    (MXU dtype)
    sc_ref   : (3, Cout)                fused BN scale (rows: low, mid, high), f32
    sh_ref   : (3, Cout)                fused BN shift, f32
    o_ref    : (n_batch*L_out, C_pad)   pooled [low|stem|mid|stem|high|stem], lane-padded
    pool_scr : (n_batch*L, C_pad)       pre-maxed pooling scratch (lane-dense, aligned)
    """
    B, L, C = n_batch, seq_len, c_out
    L_out = L // 2
    R = B * L
    C_pad = o_ref.shape[1]
    C_cat = 6 * C
    mxu = ws_ref.dtype

    if B > 1:
        # row position inside its batch element; masks shifts that would otherwise
        # read across element boundaries in the flattened row space.
        pos = lax.broadcasted_iota(jnp.int32, (R, 1), 0) % L

    def shifted(v, s, fill):
        """result[r] = v[r + s] within each batch element, `fill` outside."""
        if s == 0:
            return v
        c = v.shape[1]
        pad_rows = jnp.full((abs(s), c), fill, v.dtype)
        if s > 0:
            sv = jnp.concatenate([v[s:, :], pad_rows], axis=0)
        else:
            sv = jnp.concatenate([pad_rows, v[:R + s, :]], axis=0)
        if B > 1:
            valid = jnp.logical_and(pos + s >= 0, pos + s < L)
            sv = jnp.where(valid, sv, jnp.full_like(sv, fill))
        return sv

    def conv_taps(lhs_f32, w_ref):
        """'same' Conv1d by per-tap accumulation: sum_j dot(shift(lhs, j-k//2), w[j]).

        No im2col staging buffer, no zero-padded block-diagonal weight; works for any
        channel count (no 128-alignment requirement on the lane concat)."""
        k = w_ref.shape[0]
        acc = None
        for j in range(k):
            lhs_j = shifted(lhs_f32, j - k // 2, 0.0).astype(mxu)
            contrib = jnp.dot(lhs_j, w_ref[j], preferred_element_type=jnp.float32)
            acc = contrib if acc is None else acc + contrib
        return acc                                               # (R, Cout) f32

    # ---- stem Conv1d(Cin -> Cout, k=3, padding=1) --------------------------------
    x = x_ref[...]                                               # f32
    out = conv_taps(x, ws_ref)                                   # (R, Cout) f32

    # ---- per-branch fused BN (scale/shift, f32) + ReLU ----------------------------
    sc = sc_ref[...]
    sh = sh_ref[...]
    a_low = jnp.maximum(out * sc[0:1, :] + sh[0:1, :], 0.0)
    a_mid = jnp.maximum(out * sc[1:2, :] + sh[1:2, :], 0.0)
    a_high = jnp.maximum(out * sc[2:3, :] + sh[2:3, :], 0.0)

    # ---- branch convs (k=3 / 5 / 7), per-tap accumulated --------------------------
    y_low = conv_taps(a_low, wl_ref)
    y_mid = conv_taps(a_mid, wm_ref)
    y_high = conv_taps(a_high, wh_ref)

    # torch channel order after the three concats: [low | stem | mid | stem | high | stem]
    pieces = [y_low, out, y_mid, out, y_high, out]
    if C_pad > C_cat:
        pieces.append(jnp.zeros((R, C_pad - C_cat), jnp.float32))
    pool_in = jnp.concatenate(pieces, axis=1)                    # (R, C_pad) f32

    # ---- MaxPool1d(kernel=4, stride=2, padding=1), vectorized over the block ------
    #   m[r] = max(in[r-1], in[r], in[r+1], in[r+2]) within each element
    #   out[t] = m[2t]  (single stride-2 down-select over the whole block)
    m = pool_in
    for s in (-1, 1, 2):
        m = jnp.maximum(m, shifted(pool_in, s, -jnp.inf))
    pool_scr[...] = m                                            # lane-dense, aligned
    o_ref[...] = pool_scr[pl.ds(0, B * L_out, stride=2), :].astype(o_ref.dtype)


def _round_up(v, m):
    return ((v + m - 1) // m) * m


def _pick_batch_block(N, L, L_out, max_rows):
    """Batch elements folded into one grid step.

    Flattened row counts (bb*L in, bb*L_out out) must stay sublane-aligned (multiple
    of 8) unless the block covers the whole array. Blocks grow toward `max_rows`
    (amortizes the ~0.35us/step grid overhead, approaches the HBM roofline) but always
    leave >= 2 grid steps when N > 1 so both v7x TensorCores get work under
    dimension_semantics=("parallel",). Non-divisor N is handled by a ragged
    (clipped) last block in the caller.
    """
    base = 1
    while base <= N and ((base * L) % 8 or (base * L_out) % 8):
        base += 1
    if base > N:
        return N                       # single full block (block shape == array shape)
    bb = base
    while True:
        nxt = bb + base
        if nxt >= N:                   # keep >= 2 grid steps
            break
        if nxt * L > max_rows:
            break
        bb = nxt
    return bb


def _const_spec(shape):
    """Full-array spec for operands whose block never changes across the grid.

    pipeline_mode=pl.Buffered(1) drops the useless second pipeline buffer (pure VMEM
    savings); silently fall back if this jax version's BlockSpec lacks it."""
    nd = len(shape)
    index_map = lambda i: (0,) * nd
    try:
        return pl.BlockSpec(shape, index_map, pipeline_mode=pl.Buffered(1))
    except TypeError:
        return pl.BlockSpec(shape, index_map)


def special_block_forward(x_ncl, params, *, mxu_dtype=jnp.bfloat16):
    """x_ncl: (N, Cin, L) float32, PyTorch Conv1d layout. Returns (N, 6*Cout, L//2).

    mxu_dtype=jnp.bfloat16 (default) gives ~2x MXU throughput on v5e/v6e/v7x and halves
    weight VMEM/DMA; all elementwise BN/ReLU/max-pool math stays float32 either way.
    Pass jnp.float32 for bit-exact-ish convolutions."""
    N, Cin, L = x_ncl.shape
    assert L % 2 == 0, "MaxPool1d(4, stride=2, padding=1) path assumes even L"
    Cout = params['w0'].shape[0]
    L_out = L // 2
    C_cat = 6 * Cout
    C_pad = _round_up(C_cat, 128)                 # lane-dense output / scratch stores
    w_bytes = jnp.finfo(mxu_dtype).bits // 8

    # --- VMEM budget -> rows per grid step ----------------------------------------
    # Per-row peak estimate: double-buffered x block, double-buffered pooled output
    # block (half the rows, C_pad lanes), the pool scratch, and the largest live f32
    # temporaries (pool_in, running max, one shifted copy, conv activations).
    row_bytes = (2 * Cin * 4                      # x block, double-buffered, f32
                 + C_pad * 4                      # output block (rows/2, double-buffered)
                 + C_pad * 4                      # pool scratch
                 + (3 * C_pad + 8 * Cout + 2 * Cin) * 4)   # temporary / spill headroom
    const_bytes = (3 * Cin * Cout + 15 * Cout * Cout) * w_bytes + 6 * Cout * 4
    budget = 40 * 2 ** 20                         # headroom under v7x's 64 MiB VMEM
    max_rows = min(1024, max(L, (budget - const_bytes) // max(row_bytes, 1)))

    bb = _pick_batch_block(N, L, L_out, max_rows)
    rows = bb * L
    grid = (pl.cdiv(N, bb),)                      # ragged last block allowed
    vmem_limit = int(min(48 * 2 ** 20,
                         max(32 * 2 ** 20,
                             const_bytes + rows * row_bytes + (4 << 20))))

    # activations: channels-last, batch folded into rows (kept f32; Cin is small so the
    # input DMA is cheap, and f32 row blocks avoid any bf16 sublane-tiling constraints)
    x_rows = jnp.transpose(x_ncl, (0, 2, 1)).reshape(N * L, Cin).astype(jnp.float32)

    def taps(w):  # torch (Co, Ci, k) -> per-tap layout (k, Ci, Co)
        return jnp.transpose(w, (2, 1, 0)).astype(mxu_dtype)

    w_stem = taps(params['w0'])                   # (3, Cin,  Cout)
    w_low = taps(params['wl'])                    # (3, Cout, Cout)
    w_mid = taps(params['wm'])                    # (5, Cout, Cout)
    w_high = taps(params['wh'])                   # (7, Cout, Cout)

    def fuse_bn(gamma, beta, mean, var):
        s = gamma / jnp.sqrt(var + BN_EPS)
        return s, beta - mean * s

    s_l, t_l = fuse_bn(*params['bn_low'])
    s_m, t_m = fuse_bn(*params['bn_mid'])
    s_h, t_h = fuse_bn(*params['bn_high'])
    bn_scale = jnp.stack([s_l, s_m, s_h]).astype(jnp.float32)    # (3, Cout)
    bn_shift = jnp.stack([t_l, t_m, t_h]).astype(jnp.float32)    # (3, Cout)

    kernel = functools.partial(special_block_kernel,
                               n_batch=bb, seq_len=L, c_out=Cout)

    grid_spec = pltpu.PrefetchScalarGridSpec(
        num_scalar_prefetch=0,
        grid=grid,
        in_specs=[
            pl.BlockSpec((bb * L, Cin), lambda i: (i, 0)),
            _const_spec((3, Cin, Cout)),
            _const_spec((3, Cout, Cout)),
            _const_spec((5, Cout, Cout)),
            _const_spec((7, Cout, Cout)),
            _const_spec((3, Cout)),
            _const_spec((3, Cout)),
        ],
        out_specs=pl.BlockSpec((bb * L_out, C_pad), lambda i: (i, 0)),
        scratch_shapes=[pltpu.VMEM((bb * L, C_pad), jnp.float32)],
    )

    pooled = pl.pallas_call(
        kernel,
        out_shape=jax.ShapeDtypeStruct((N * L_out, C_pad), jnp.float32),
        grid_spec=grid_spec,
        compiler_params=pltpu.CompilerParams(
            dimension_semantics=("parallel",),
            vmem_limit_bytes=vmem_limit),
    )(x_rows, w_stem, w_low, w_mid, w_high, bn_scale, bn_shift)

    # wrapper-side layout plumbing only: drop lane padding, restore PyTorch NCL layout.
    p = pooled[:, :C_cat].reshape(N, L_out, C_cat)
    return jnp.transpose(p, (0, 2, 1))


def special_block_reference(x, params):
    """Pure-JAX reference (PyTorch NCL layout, inference-mode BN)."""
    def conv1d(a, w, pad):
        return lax.conv_general_dilated(a, w, window_strides=(1,),
                                        padding=[(pad, pad)],
                                        dimension_numbers=('NCH', 'OIH', 'NCH'))

    def bn(a, g, b, m, v):
        return ((a - m[None, :, None]) / jnp.sqrt(v + BN_EPS)[None, :, None]
                * g[None, :, None] + b[None, :, None])

    out = conv1d(x, params['w0'], 1)
    o1 = jnp.concatenate([conv1d(jax.nn.relu(bn(out, *params['bn_low'])), params['wl'], 1), out], axis=1)
    o2 = jnp.concatenate([conv1d(jax.nn.relu(bn(out, *params['bn_mid'])), params['wm'], 2), out], axis=1)
    o3 = jnp.concatenate([conv1d(jax.nn.relu(bn(out, *params['bn_high'])), params['wh'], 3), out], axis=1)
    cat = jnp.concatenate([o1, o2, o3], axis=1)
    return lax.reduce_window(cat, -jnp.inf, lax.max,
                             window_dimensions=(1, 1, 4),
                             window_strides=(1, 1, 2),
                             padding=[(0, 0), (0, 0), (1, 1)])


if __name__ == "__main__":
    N, Cin, Cout, L = 2, 4, 8, 16
    key = jax.random.PRNGKey(0)
    ks = jax.random.split(key, 17)

    x = jax.random.normal(ks[0], (N, Cin, L), jnp.float32)

    def bn_params(k1, k2, k3, k4):
        gamma = 1.0 + 0.1 * jax.random.normal(ks[k1], (Cout,), jnp.float32)
        beta = 0.1 * jax.random.normal(ks[k2], (Cout,), jnp.float32)
        mean = 0.1 * jax.random.normal(ks[k3], (Cout,), jnp.float32)
        var = 1.0 + 0.1 * jnp.abs(jax.random.normal(ks[k4], (Cout,), jnp.float32))
        return (gamma, beta, mean, var)

    params = {
        'w0': 0.3 * jax.random.normal(ks[1], (Cout, Cin, 3), jnp.float32),
        'wl': 0.3 * jax.random.normal(ks[2], (Cout, Cout, 3), jnp.float32),
        'wm': 0.3 * jax.random.normal(ks[3], (Cout, Cout, 5), jnp.float32),
        'wh': 0.3 * jax.random.normal(ks[4], (Cout, Cout, 7), jnp.float32),
        'bn_low': bn_params(5, 6, 7, 8),
        'bn_mid': bn_params(9, 10, 11, 12),
        'bn_high': bn_params(13, 14, 15, 16),
    }

    y_ref = special_block_reference(x, params)

    # strict check on the f32 MXU path
    y32 = special_block_forward(x, params, mxu_dtype=jnp.float32)
    jax.block_until_ready(y32)
    assert y32.shape == (N, 6 * Cout, L // 2), y32.shape
    err32 = float(jnp.max(jnp.abs(y32 - y_ref)))
    assert jnp.allclose(y32, y_ref, atol=1e-3, rtol=1e-3), err32

    # default (bf16 MXU) perf path: looser tolerance for bf16 operand rounding
    y = special_block_forward(x, params)
    jax.block_until_ready(y)
    assert y.shape == (N, 6 * Cout, L // 2), y.shape
    err = float(jnp.max(jnp.abs(y - y_ref)))
    assert jnp.allclose(y, y_ref, atol=1e-1, rtol=5e-2), err

    print("KERNEL_OK")
</pallas_src>

<mosaic_0001>
module attributes {stable_mosaic.version = 11 : i64} {
  func.func @special_block_kernel(%arg0: i32, %arg1: memref<16x4xf32, #tpu.memory_space<vmem>>, %arg2: memref<3x4x8xf32, #tpu.memory_space<vmem>>, %arg3: memref<3x8x8xf32, #tpu.memory_space<vmem>>, %arg4: memref<5x8x8xf32, #tpu.memory_space<vmem>>, %arg5: memref<7x8x8xf32, #tpu.memory_space<vmem>>, %arg6: memref<3x8xf32, #tpu.memory_space<vmem>>, %arg7: memref<3x8xf32, #tpu.memory_space<vmem>>, %arg8: memref<8x128xf32, #tpu.memory_space<vmem>>, %arg9: memref<16x128xf32, #tpu.memory_space<vmem>>) attributes {dimension_semantics = [#tpu.dimension_semantics<parallel>], iteration_bounds = array<i64: 2>, scalar_prefetch = 0 : i64, scratch_operands = 1 : i64, tpu.core_type = #tpu.core_type<tc>, window_params = [{transform_indices = @transform_0, window_bounds = array<i64: 16, 4>}, {pipeline_mode = #tpu.pipeline_mode<synchronous>, transform_indices = @transform_1, window_bounds = array<i64: 3, 4, 8>}, {pipeline_mode = #tpu.pipeline_mode<synchronous>, transform_indices = @transform_2, window_bounds = array<i64: 3, 8, 8>}, {pipeline_mode = #tpu.pipeline_mode<synchronous>, transform_indices = @transform_3, window_bounds = array<i64: 5, 8, 8>}, {pipeline_mode = #tpu.pipeline_mode<synchronous>, transform_indices = @transform_4, window_bounds = array<i64: 7, 8, 8>}, {pipeline_mode = #tpu.pipeline_mode<synchronous>, transform_indices = @transform_5, window_bounds = array<i64: 3, 8>}, {pipeline_mode = #tpu.pipeline_mode<synchronous>, transform_indices = @transform_6, window_bounds = array<i64: 3, 8>}, {transform_indices = @transform_7, window_bounds = array<i64: 8, 128>}]} {
    %c0 = arith.constant 0 : index
    %c0_0 = arith.constant 0 : index
    %0 = vector.load %arg1[%c0, %c0_0] : memref<16x4xf32, #tpu.memory_space<vmem>>, vector<16x4xf32>
    %cst = arith.constant 0.000000e+00 : f32
    %1 = vector.broadcast %cst : f32 to vector<1x4xf32>
    %2 = vector.extract_strided_slice %0 {offsets = [0, 0], sizes = [15, 4], strides = [1, 1]} : vector<16x4xf32> to vector<15x4xf32>
    %3 = tpu.concatenate %1, %2 in 0 : vector<1x4xf32>, vector<15x4xf32> -> vector<16x4xf32>
    %c0_1 = arith.constant 0 : index
    %c0_2 = arith.constant 0 : index
    %c0_3 = arith.constant 0 : index
    %4 = vector.load %arg2[%c0_1, %c0_2, %c0_3] : memref<3x4x8xf32, #tpu.memory_space<vmem>>, vector<1x4x8xf32>
    %5 = vector.shape_cast %4 : vector<1x4x8xf32> to vector<4x8xf32>
    %cst_4 = arith.constant dense<0.000000e+00> : vector<16x8xf32>
    %6 = tpu.matmul %3, %5, %cst_4 {dimension_numbers = #tpu.dot_dimension_numbers<[1], [0], [0], [1], [0, 0, 1, 1], [], []>} : vector<16x4xf32>, vector<4x8xf32>, vector<16x8xf32> -> vector<16x8xf32>
    %c1 = arith.constant 1 : index
    %c0_5 = arith.constant 0 : index
    %c0_6 = arith.constant 0 : index
    %7 = vector.load %arg2[%c1, %c0_5, %c0_6] : memref<3x4x8xf32, #tpu.memory_space<vmem>>, vector<1x4x8xf32>
    %8 = vector.shape_cast %7 : vector<1x4x8xf32> to vector<4x8xf32>
    %cst_7 = arith.constant dense<0.000000e+00> : vector<16x8xf32>
    %9 = tpu.matmul %0, %8, %cst_7 {dimension_numbers = #tpu.dot_dimension_numbers<[1], [0], [0], [1], [0, 0, 1, 1], [], []>} : vector<16x4xf32>, vector<4x8xf32>, vector<16x8xf32> -> vector<16x8xf32>
    %10 = arith.addf %6, %9 : vector<16x8xf32>
    %cst_8 = arith.constant 0.000000e+00 : f32
    %11 = vector.broadcast %cst_8 : f32 to vector<1x4xf32>
    %12 = vector.extract_strided_slice %0 {offsets = [1, 0], sizes = [15, 4], strides = [1, 1]} : vector<16x4xf32> to vector<15x4xf32>
    %13 = tpu.concatenate %12, %11 in 0 : vector<15x4xf32>, vector<1x4xf32> -> vector<16x4xf32>
    %c2 = arith.constant 2 : index
    %c0_9 = arith.constant 0 : index
    %c0_10 = arith.constant 0 : index
    %14 = vector.load %arg2[%c2, %c0_9, %c0_10] : memref<3x4x8xf32, #tpu.memory_space<vmem>>, vector<1x4x8xf32>
    %15 = vector.shape_cast %14 : vector<1x4x8xf32> to vector<4x8xf32>
    %cst_11 = arith.constant dense<0.000000e+00> : vector<16x8xf32>
    %16 = tpu.matmul %13, %15, %cst_11 {dimension_numbers = #tpu.dot_dimension_numbers<[1], [0], [0], [1], [0, 0, 1, 1], [], []>} : vector<16x4xf32>, vector<4x8xf32>, vector<16x8xf32> -> vector<16x8xf32>
    %17 = arith.addf %10, %16 : vector<16x8xf32>
    %c0_12 = arith.constant 0 : index
    %c0_13 = arith.constant 0 : index
    %18 = vector.load %arg6[%c0_12, %c0_13] : memref<3x8xf32, #tpu.memory_space<vmem>>, vector<3x8xf32>
    %c0_14 = arith.constant 0 : index
    %c0_15 = arith.constant 0 : index
    %19 = vector.load %arg7[%c0_14, %c0_15] : memref<3x8xf32, #tpu.memory_space<vmem>>, vector<3x8xf32>
    %20 = vector.extract_strided_slice %18 {offsets = [0, 0], sizes = [1, 8], strides = [1, 1]} : vector<3x8xf32> to vector<1x8xf32>
    %21 = vector.broadcast %20 : vector<1x8xf32> to vector<16x8xf32>
    %22 = arith.mulf %17, %21 : vector<16x8xf32>
    %23 = vector.extract_strided_slice %19 {offsets = [0, 0], sizes = [1, 8], strides = [1, 1]} : vector<3x8xf32> to vector<1x8xf32>
    %24 = vector.broadcast %23 : vector<1x8xf32> to vector<16x8xf32>
    %25 = arith.addf %22, %24 : vector<16x8xf32>
    %cst_16 = arith.constant 0.000000e+00 : f32
    %26 = vector.broadcast %cst_16 : f32 to vector<16x8xf32>
    %27 = arith.maximumf %25, %26 : vector<16x8xf32>
    %28 = vector.extract_strided_slice %18 {offsets = [1, 0], sizes = [1, 8], strides = [1, 1]} : vector<3x8xf32> to vector<1x8xf32>
    %29 = vector.broadcast %28 : vector<1x8xf32> to vector<16x8xf32>
    %30 = arith.mulf %17, %29 : vector<16x8xf32>
    %31 = vector.extract_strided_slice %19 {offsets = [1, 0], sizes = [1, 8], strides = [1, 1]} : vector<3x8xf32> to vector<1x8xf32>
    %32 = vector.broadcast %31 : vector<1x8xf32> to vector<16x8xf32>
    %33 = arith.addf %30, %32 : vector<16x8xf32>
    %cst_17 = arith.constant 0.000000e+00 : f32
    %34 = vector.broadcast %cst_17 : f32 to vector<16x8xf32>
    %35 = arith.maximumf %33, %34 : vector<16x8xf32>
    %36 = vector.extract_strided_slice %18 {offsets = [2, 0], sizes = [1, 8], strides = [1, 1]} : vector<3x8xf32> to vector<1x8xf32>
    %37 = vector.broadcast %36 : vector<1x8xf32> to vector<16x8xf32>
    %38 = arith.mulf %17, %37 : vector<16x8xf32>
    %39 = vector.extract_strided_slice %19 {offsets = [2, 0], sizes = [1, 8], strides = [1, 1]} : vector<3x8xf32> to vector<1x8xf32>
    %40 = vector.broadcast %39 : vector<1x8xf32> to vector<16x8xf32>
    %41 = arith.addf %38, %40 : vector<16x8xf32>
    %cst_18 = arith.constant 0.000000e+00 : f32
    %42 = vector.broadcast %cst_18 : f32 to vector<16x8xf32>
    %43 = arith.maximumf %41, %42 : vector<16x8xf32>
    %cst_19 = arith.constant 0.000000e+00 : f32
    %44 = vector.broadcast %cst_19 : f32 to vector<1x8xf32>
    %45 = vector.extract_strided_slice %27 {offsets = [0, 0], sizes = [15, 8], strides = [1, 1]} : vector<16x8xf32> to vector<15x8xf32>
    %46 = tpu.concatenate %44, %45 in 0 : vector<1x8xf32>, vector<15x8xf32> -> vector<16x8xf32>
    %c0_20 = arith.constant 0 : index
    %c0_21 = arith.constant 0 : index
    %c0_22 = arith.constant 0 : index
    %47 = vector.load %arg3[%c0_20, %c0_21, %c0_22] : memref<3x8x8xf32, #tpu.memory_space<vmem>>, vector<1x8x8xf32>
    %48 = vector.shape_cast %47 : vector<1x8x8xf32> to vector<8x8xf32>
    %cst_23 = arith.constant dense<0.000000e+00> : vector<16x8xf32>
    %49 = tpu.matmul %46, %48, %cst_23 {dimension_numbers = #tpu.dot_dimension_numbers<[1], [0], [0], [1], [0, 0, 1, 1], [], []>} : vector<16x8xf32>, vector<8x8xf32>, vector<16x8xf32> -> vector<16x8xf32>
    %c1_24 = arith.constant 1 : index
    %c0_25 = arith.constant 0 : index
    %c0_26 = arith.constant 0 : index
    %50 = vector.load %arg3[%c1_24, %c0_25, %c0_26] : memref<3x8x8xf32, #tpu.memory_space<vmem>>, vector<1x8x8xf32>
    %51 = vector.shape_cast %50 : vector<1x8x8xf32> to vector<8x8xf32>
    %cst_27 = arith.constant dense<0.000000e+00> : vector<16x8xf32>
    %52 = tpu.matmul %27, %51, %cst_27 {dimension_numbers = #tpu.dot_dimension_numbers<[1], [0], [0], [1], [0, 0, 1, 1], [], []>} : vector<16x8xf32>, vector<8x8xf32>, vector<16x8xf32> -> vector<16x8xf32>
    %53 = arith.addf %49, %52 : vector<16x8xf32>
    %cst_28 = arith.constant 0.000000e+00 : f32
    %54 = vector.broadcast %cst_28 : f32 to vector<1x8xf32>
    %55 = vector.extract_strided_slice %27 {offsets = [1, 0], sizes = [15, 8], strides = [1, 1]} : vector<16x8xf32> to vector<15x8xf32>
    %56 = tpu.concatenate %55, %54 in 0 : vector<15x8xf32>, vector<1x8xf32> -> vector<16x8xf32>
    %c2_29 = arith.constant 2 : index
    %c0_30 = arith.constant 0 : index
    %c0_31 = arith.constant 0 : index
    %57 = vector.load %arg3[%c2_29, %c0_30, %c0_31] : memref<3x8x8xf32, #tpu.memory_space<vmem>>, vector<1x8x8xf32>
    %58 = vector.shape_cast %57 : vector<1x8x8xf32> to vector<8x8xf32>
    %cst_32 = arith.constant dense<0.000000e+00> : vector<16x8xf32>
    %59 = tpu.matmul %56, %58, %cst_32 {dimension_numbers = #tpu.dot_dimension_numbers<[1], [0], [0], [1], [0, 0, 1, 1], [], []>} : vector<16x8xf32>, vector<8x8xf32>, vector<16x8xf32> -> vector<16x8xf32>
    %60 = arith.addf %53, %59 : vector<16x8xf32>
    %cst_33 = arith.constant 0.000000e+00 : f32
    %61 = vector.broadcast %cst_33 : f32 to vector<2x8xf32>
    %62 = vector.extract_strided_slice %35 {offsets = [0, 0], sizes = [14, 8], strides = [1, 1]} : vector<16x8xf32> to vector<14x8xf32>
    %63 = tpu.concatenate %61, %62 in 0 : vector<2x8xf32>, vector<14x8xf32> -> vector<16x8xf32>
    %c0_34 = arith.constant 0 : index
    %c0_35 = arith.constant 0 : index
    %c0_36 = arith.constant 0 : index
    %64 = vector.load %arg4[%c0_34, %c0_35, %c0_36] : memref<5x8x8xf32, #tpu.memory_space<vmem>>, vector<1x8x8xf32>
    %65 = vector.shape_cast %64 : vector<1x8x8xf32> to vector<8x8xf32>
    %cst_37 = arith.constant dense<0.000000e+00> : vector<16x8xf32>
    %66 = tpu.matmul %63, %65, %cst_37 {dimension_numbers = #tpu.dot_dimension_numbers<[1], [0], [0], [1], [0, 0, 1, 1], [], []>} : vector<16x8xf32>, vector<8x8xf32>, vector<16x8xf32> -> vector<16x8xf32>
    %cst_38 = arith.constant 0.000000e+00 : f32
    %67 = vector.broadcast %cst_38 : f32 to vector<1x8xf32>
    %68 = vector.extract_strided_slice %35 {offsets = [0, 0], sizes = [15, 8], strides = [1, 1]} : vector<16x8xf32> to vector<15x8xf32>
    %69 = tpu.concatenate %67, %68 in 0 : vector<1x8xf32>, vector<15x8xf32> -> vector<16x8xf32>
    %c1_39 = arith.constant 1 : index
    %c0_40 = arith.constant 0 : index
    %c0_41 = arith.constant 0 : index
    %70 = vector.load %arg4[%c1_39, %c0_40, %c0_41] : memref<5x8x8xf32, #tpu.memory_space<vmem>>, vector<1x8x8xf32>
    %71 = vector.shape_cast %70 : vector<1x8x8xf32> to vector<8x8xf32>
    %cst_42 = arith.constant dense<0.000000e+00> : vector<16x8xf32>
    %72 = tpu.matmul %69, %71, %cst_42 {dimension_numbers = #tpu.dot_dimension_numbers<[1], [0], [0], [1], [0, 0, 1, 1], [], []>} : vector<16x8xf32>, vector<8x8xf32>, vector<16x8xf32> -> vector<16x8xf32>
    %73 = arith.addf %66, %72 : vector<16x8xf32>
    %c2_43 = arith.constant 2 : index
    %c0_44 = arith.constant 0 : index
    %c0_45 = arith.constant 0 : index
    %74 = vector.load %arg4[%c2_43, %c0_44, %c0_45] : memref<5x8x8xf32, #tpu.memory_space<vmem>>, vector<1x8x8xf32>
    %75 = vector.shape_cast %74 : vector<1x8x8xf32> to vector<8x8xf32>
    %cst_46 = arith.constant dense<0.000000e+00> : vector<16x8xf32>
    %76 = tpu.matmul %35, %75, %cst_46 {dimension_numbers = #tpu.dot_dimension_numbers<[1], [0], [0], [1], [0, 0, 1, 1], [], []>} : vector<16x8xf32>, vector<8x8xf32>, vector<16x8xf32> -> vector<16x8xf32>
    %77 = arith.addf %73, %76 : vector<16x8xf32>
    %cst_47 = arith.constant 0.000000e+00 : f32
    %78 = vector.broadcast %cst_47 : f32 to vector<1x8xf32>
    %79 = vector.extract_strided_slice %35 {offsets = [1, 0], sizes = [15, 8], strides = [1, 1]} : vector<16x8xf32> to vector<15x8xf32>
    %80 = tpu.concatenate %79, %78 in 0 : vector<15x8xf32>, vector<1x8xf32> -> vector<16x8xf32>
    %c3 = arith.constant 3 : index
    %c0_48 = arith.constant 0 : index
    %c0_49 = arith.constant 0 : index
    %81 = vector.load %arg4[%c3, %c0_48, %c0_49] : memref<5x8x8xf32, #tpu.memory_space<vmem>>, vector<1x8x8xf32>
    %82 = vector.shape_cast %81 : vector<1x8x8xf32> to vector<8x8xf32>
    %cst_50 = arith.constant dense<0.000000e+00> : vector<16x8xf32>
    %83 = tpu.matmul %80, %82, %cst_50 {dimension_numbers = #tpu.dot_dimension_numbers<[1], [0], [0], [1], [0, 0, 1, 1], [], []>} : vector<16x8xf32>, vector<8x8xf32>, vector<16x8xf32> -> vector<16x8xf32>
    %84 = arith.addf %77, %83 : vector<16x8xf32>
    %cst_51 = arith.constant 0.000000e+00 : f32
    %85 = vector.broadcast %cst_51 : f32 to vector<2x8xf32>
    %86 = vector.extract_strided_slice %35 {offsets = [2, 0], sizes = [14, 8], strides = [1, 1]} : vector<16x8xf32> to vector<14x8xf32>
    %87 = tpu.concatenate %86, %85 in 0 : vector<14x8xf32>, vector<2x8xf32> -> vector<16x8xf32>
    %c4 = arith.constant 4 : index
    %c0_52 = arith.constant 0 : index
    %c0_53 = arith.constant 0 : index
    %88 = vector.load %arg4[%c4, %c0_52, %c0_53] : memref<5x8x8xf32, #tpu.memory_space<vmem>>, vector<1x8x8xf32>
    %89 = vector.shape_cast %88 : vector<1x8x8xf32> to vector<8x8xf32>
    %cst_54 = arith.constant dense<0.000000e+00> : vector<16x8xf32>
    %90 = tpu.matmul %87, %89, %cst_54 {dimension_numbers = #tpu.dot_dimension_numbers<[1], [0], [0], [1], [0, 0, 1, 1], [], []>} : vector<16x8xf32>, vector<8x8xf32>, vector<16x8xf32> -> vector<16x8xf32>
    %91 = arith.addf %84, %90 : vector<16x8xf32>
    %cst_55 = arith.constant 0.000000e+00 : f32
    %92 = vector.broadcast %cst_55 : f32 to vector<3x8xf32>
    %93 = vector.extract_strided_slice %43 {offsets = [0, 0], sizes = [13, 8], strides = [1, 1]} : vector<16x8xf32> to vector<13x8xf32>
    %94 = tpu.concatenate %92, %93 in 0 : vector<3x8xf32>, vector<13x8xf32> -> vector<16x8xf32>
    %c0_56 = arith.constant 0 : index
    %c0_57 = arith.constant 0 : index
    %c0_58 = arith.constant 0 : index
    %95 = vector.load %arg5[%c0_56, %c0_57, %c0_58] : memref<7x8x8xf32, #tpu.memory_space<vmem>>, vector<1x8x8xf32>
    %96 = vector.shape_cast %95 : vector<1x8x8xf32> to vector<8x8xf32>
    %cst_59 = arith.constant dense<0.000000e+00> : vector<16x8xf32>
    %97 = tpu.matmul %94, %96, %cst_59 {dimension_numbers = #tpu.dot_dimension_numbers<[1], [0], [0], [1], [0, 0, 1, 1], [], []>} : vector<16x8xf32>, vector<8x8xf32>, vector<16x8xf32> -> vector<16x8xf32>
    %cst_60 = arith.constant 0.000000e+00 : f32
    %98 = vector.broadcast %cst_60 : f32 to vector<2x8xf32>
    %99 = vector.extract_strided_slice %43 {offsets = [0, 0], sizes = [14, 8], strides = [1, 1]} : vector<16x8xf32> to vector<14x8xf32>
    %100 = tpu.concatenate %98, %99 in 0 : vector<2x8xf32>, vector<14x8xf32> -> vector<16x8xf32>
    %c1_61 = arith.constant 1 : index
    %c0_62 = arith.constant 0 : index
    %c0_63 = arith.constant 0 : index
    %101 = vector.load %arg5[%c1_61, %c0_62, %c0_63] : memref<7x8x8xf32, #tpu.memory_space<vmem>>, vector<1x8x8xf32>
    %102 = vector.shape_cast %101 : vector<1x8x8xf32> to vector<8x8xf32>
    %cst_64 = arith.constant dense<0.000000e+00> : vector<16x8xf32>
    %103 = tpu.matmul %100, %102, %cst_64 {dimension_numbers = #tpu.dot_dimension_numbers<[1], [0], [0], [1], [0, 0, 1, 1], [], []>} : vector<16x8xf32>, vector<8x8xf32>, vector<16x8xf32> -> vector<16x8xf32>
    %104 = arith.addf %97, %103 : vector<16x8xf32>
    %cst_65 = arith.constant 0.000000e+00 : f32
    %105 = vector.broadcast %cst_65 : f32 to vector<1x8xf32>
    %106 = vector.extract_strided_slice %43 {offsets = [0, 0], sizes = [15, 8], strides = [1, 1]} : vector<16x8xf32> to vector<15x8xf32>
    %107 = tpu.concatenate %105, %106 in 0 : vector<1x8xf32>, vector<15x8xf32> -> vector<16x8xf32>
    %c2_66 = arith.constant 2 : index
    %c0_67 = arith.constant 0 : index
    %c0_68 = arith.constant 0 : index
    %108 = vector.load %arg5[%c2_66, %c0_67, %c0_68] : memref<7x8x8xf32, #tpu.memory_space<vmem>>, vector<1x8x8xf32>
    %109 = vector.shape_cast %108 : vector<1x8x8xf32> to vector<8x8xf32>
    %cst_69 = arith.constant dense<0.000000e+00> : vector<16x8xf32>
    %110 = tpu.matmul %107, %109, %cst_69 {dimension_numbers = #tpu.dot_dimension_numbers<[1], [0], [0], [1], [0, 0, 1, 1], [], []>} : vector<16x8xf32>, vector<8x8xf32>, vector<16x8xf32> -> vector<16x8xf32>
    %111 = arith.addf %104, %110 : vector<16x8xf32>
    %c3_70 = arith.constant 3 : index
    %c0_71 = arith.constant 0 : index
    %c0_72 = arith.constant 0 : index
    %112 = vector.load %arg5[%c3_70, %c0_71, %c0_72] : memref<7x8x8xf32, #tpu.memory_space<vmem>>, vector<1x8x8xf32>
    %113 = vector.shape_cast %112 : vector<1x8x8xf32> to vector<8x8xf32>
    %cst_73 = arith.constant dense<0.000000e+00> : vector<16x8xf32>
    %114 = tpu.matmul %43, %113, %cst_73 {dimension_numbers = #tpu.dot_dimension_numbers<[1], [0], [0], [1], [0, 0, 1, 1], [], []>} : vector<16x8xf32>, vector<8x8xf32>, vector<16x8xf32> -> vector<16x8xf32>
    %115 = arith.addf %111, %114 : vector<16x8xf32>
    %cst_74 = arith.constant 0.000000e+00 : f32
    %116 = vector.broadcast %cst_74 : f32 to vector<1x8xf32>
    %117 = vector.extract_strided_slice %43 {offsets = [1, 0], sizes = [15, 8], strides = [1, 1]} : vector<16x8xf32> to vector<15x8xf32>
    %118 = tpu.concatenate %117, %116 in 0 : vector<15x8xf32>, vector<1x8xf32> -> vector<16x8xf32>
    %c4_75 = arith.constant 4 : index
    %c0_76 = arith.constant 0 : index
    %c0_77 = arith.constant 0 : index
    %119 = vector.load %arg5[%c4_75, %c0_76, %c0_77] : memref<7x8x8xf32, #tpu.memory_space<vmem>>, vector<1x8x8xf32>
    %120 = vector.shape_cast %119 : vector<1x8x8xf32> to vector<8x8xf32>
    %cst_78 = arith.constant dense<0.000000e+00> : vector<16x8xf32>
    %121 = tpu.matmul %118, %120, %cst_78 {dimension_numbers = #tpu.dot_dimension_numbers<[1], [0], [0], [1], [0, 0, 1, 1], [], []>} : vector<16x8xf32>, vector<8x8xf32>, vector<16x8xf32> -> vector<16x8xf32>
    %122 = arith.addf %115, %121 : vector<16x8xf32>
    %cst_79 = arith.constant 0.000000e+00 : f32
    %123 = vector.broadcast %cst_79 : f32 to vector<2x8xf32>
    %124 = vector.extract_strided_slice %43 {offsets = [2, 0], sizes = [14, 8], strides = [1, 1]} : vector<16x8xf32> to vector<14x8xf32>
    %125 = tpu.concatenate %124, %123 in 0 : vector<14x8xf32>, vector<2x8xf32> -> vector<16x8xf32>
    %c5 = arith.constant 5 : index
    %c0_80 = arith.constant 0 : index
    %c0_81 = arith.constant 0 : index
    %126 = vector.load %arg5[%c5, %c0_80, %c0_81] : memref<7x8x8xf32, #tpu.memory_space<vmem>>, vector<1x8x8xf32>
    %127 = vector.shape_cast %126 : vector<1x8x8xf32> to vector<8x8xf32>
    %cst_82 = arith.constant dense<0.000000e+00> : vector<16x8xf32>
    %128 = tpu.matmul %125, %127, %cst_82 {dimension_numbers = #tpu.dot_dimension_numbers<[1], [0], [0], [1], [0, 0, 1, 1], [], []>} : vector<16x8xf32>, vector<8x8xf32>, vector<16x8xf32> -> vector<16x8xf32>
    %129 = arith.addf %122, %128 : vector<16x8xf32>
    %cst_83 = arith.constant 0.000000e+00 : f32
    %130 = vector.broadcast %cst_83 : f32 to vector<3x8xf32>
    %131 = vector.extract_strided_slice %43 {offsets = [3, 0], sizes = [13, 8], strides = [1, 1]} : vector<16x8xf32> to vector<13x8xf32>
    %132 = tpu.concatenate %131, %130 in 0 : vector<13x8xf32>, vector<3x8xf32> -> vector<16x8xf32>
    %c6 = arith.constant 6 : index
    %c0_84 = arith.constant 0 : index
    %c0_85 = arith.constant 0 : index
    %133 = vector.load %arg5[%c6, %c0_84, %c0_85] : memref<7x8x8xf32, #tpu.memory_space<vmem>>, vector<1x8x8xf32>
    %134 = vector.shape_cast %133 : vector<1x8x8xf32> to vector<8x8xf32>
    %cst_86 = arith.constant dense<0.000000e+00> : vector<16x8xf32>
    %135 = tpu.matmul %132, %134, %cst_86 {dimension_numbers = #tpu.dot_dimension_numbers<[1], [0], [0], [1], [0, 0, 1, 1], [], []>} : vector<16x8xf32>, vector<8x8xf32>, vector<16x8xf32> -> vector<16x8xf32>
    %136 = arith.addf %129, %135 : vector<16x8xf32>
    %cst_87 = arith.constant 0.000000e+00 : f32
    %137 = vector.broadcast %cst_87 : f32 to vector<16x80xf32>
    %138 = tpu.concatenate %60, %17, %91, %17, %136, %17, %137 in 1 : vector<16x8xf32>, vector<16x8xf32>, vector<16x8xf32>, vector<16x8xf32>, vector<16x8xf32>, vector<16x8xf32>, vector<16x80xf32> -> vector<16x128xf32>
    %cst_88 = arith.constant 0xFF800000 : f32
    %139 = vector.broadcast %cst_88 : f32 to vector<1x128xf32>
    %140 = vector.extract_strided_slice %138 {offsets = [0, 0], sizes = [15, 128], strides = [1, 1]} : vector<16x128xf32> to vector<15x128xf32>
    %141 = tpu.concatenate %139, %140 in 0 : vector<1x128xf32>, vector<15x128xf32> -> vector<16x128xf32>
    %142 = arith.maximumf %138, %141 : vector<16x128xf32>
    %cst_89 = arith.constant 0xFF800000 : f32
    %143 = vector.broadcast %cst_89 : f32 to vector<1x128xf32>
    %144 = vector.extract_strided_slice %138 {offsets = [1, 0], sizes = [15, 128], strides = [1, 1]} : vector<16x128xf32> to vector<15x128xf32>
    %145 = tpu.concatenate %144, %143 in 0 : vector<15x128xf32>, vector<1x128xf32> -> vector<16x128xf32>
    %146 = arith.maximumf %142, %145 : vector<16x128xf32>
    %cst_90 = arith.constant 0xFF800000 : f32
    %147 = vector.broadcast %cst_90 : f32 to vector<2x128xf32>
    %148 = vector.extract_strided_slice %138 {offsets = [2, 0], sizes = [14, 128], strides = [1, 1]} : vector<16x128xf32> to vector<14x128xf32>
    %149 = tpu.concatenate %148, %147 in 0 : vector<14x128xf32>, vector<2x128xf32> -> vector<16x128xf32>
    %150 = arith.maximumf %146, %149 : vector<16x128xf32>
    %c0_91 = arith.constant 0 : index
    %c0_92 = arith.constant 0 : index
    %151 = vector.load %arg9[%c0_91, %c0_92] : memref<16x128xf32, #tpu.memory_space<vmem>>, vector<16x128xf32>
    tpu.vector_store %arg9[%c0_91, %c0_92], %150 {strides = array<i32>} : memref<16x128xf32, #tpu.memory_space<vmem>>, vector<16x128xf32>,
    %c0_93 = arith.constant 0 : index
    %c0_94 = arith.constant 0 : index
    %152 = tpu.strided_load %arg9[%c0_93, %c0_94] {strides = array<i32: 2, 1>} : memref<16x128xf32, #tpu.memory_space<vmem>>, vector<8x128xf32>
    %c0_95 = arith.constant 0 : index
    %c0_96 = arith.constant 0 : index
    %153 = vector.load %arg8[%c0_95, %c0_96] : memref<8x128xf32, #tpu.memory_space<vmem>>, vector<8x128xf32>
    tpu.vector_store %arg8[%c0_95, %c0_96], %152 {strides = array<i32>} : memref<8x128xf32, #tpu.memory_space<vmem>>, vector<8x128xf32>,
    return
  }
  func.func @transform_0(%arg0: i32) -> (i32, i32) {
    %c0_i32 = arith.constant 0 : i32
    %c0_i32_0 = arith.constant 0 : i32
    return %arg0, %c0_i32 : i32, i32
  }
  func.func @transform_1(%arg0: i32) -> (i32, i32, i32) {
    %c0_i32 = arith.constant 0 : i32
    %c0_i32_0 = arith.constant 0 : i32
    %c0_i32_1 = arith.constant 0 : i32
    %c0_i32_2 = arith.constant 0 : i32
    return %c0_i32, %c0_i32_0, %c0_i32_1 : i32, i32, i32
  }
  func.func @transform_2(%arg0: i32) -> (i32, i32, i32) {
    %c0_i32 = arith.constant 0 : i32
    %c0_i32_0 = arith.constant 0 : i32
    %c0_i32_1 = arith.constant 0 : i32
    %c0_i32_2 = arith.constant 0 : i32
    return %c0_i32, %c0_i32_0, %c0_i32_1 : i32, i32, i32
  }
  func.func @transform_3(%arg0: i32) -> (i32, i32, i32) {
    %c0_i32 = arith.constant 0 : i32
    %c0_i32_0 = arith.constant 0 : i32
    %c0_i32_1 = arith.constant 0 : i32
    %c0_i32_2 = arith.constant 0 : i32
    return %c0_i32, %c0_i32_0, %c0_i32_1 : i32, i32, i32
  }
  func.func @transform_4(%arg0: i32) -> (i32, i32, i32) {
    %c0_i32 = arith.constant 0 : i32
    %c0_i32_0 = arith.constant 0 : i32
    %c0_i32_1 = arith.constant 0 : i32
    %c0_i32_2 = arith.constant 0 : i32
    return %c0_i32, %c0_i32_0, %c0_i32_1 : i32, i32, i32
  }
  func.func @transform_5(%arg0: i32) -> (i32, i32) {
    %c0_i32 = arith.constant 0 : i32
    %c0_i32_0 = arith.constant 0 : i32
    %c0_i32_1 = arith.constant 0 : i32
    return %c0_i32, %c0_i32_0 : i32, i32
  }
  func.func @transform_6(%arg0: i32) -> (i32, i32) {
    %c0_i32 = arith.constant 0 : i32
    %c0_i32_0 = arith.constant 0 : i32
    %c0_i32_1 = arith.constant 0 : i32
    return %c0_i32, %c0_i32_0 : i32, i32
  }
  func.func @transform_7(%arg0: i32) -> (i32, i32) {
    %c0_i32 = arith.constant 0 : i32
    %c0_i32_0 = arith.constant 0 : i32
    return %arg0, %c0_i32 : i32, i32
  }
}

</mosaic_0001>

<bundles_post_ra>
// kernel: tpu_custom_call.1
= control target key start
LH: loop header
LB: loop body
LE: loop exit
PB: predicated region body
PF: predicated region fallthrough
CT: control target
= control target key end

     0   :  { %s1797_s0 = inlined_call_operand.vmem [shape: f32[32,4], index: 0, kind: input, shape index: {}]   ;;  %s1798_s1 = inlined_call_operand.vmem [shape: f32[3,4,8], index: 1, kind: input, shape index: {}]   ;;  %s1799_s2 = inlined_call_operand.vmem [shape: f32[3,8,8], index: 2, kind: input, shape index: {}]   ;;  %s1800_s3 = inlined_call_operand.hbm [shape: f32[5,8,8], index: 3, kind: input, shape index: {}]   ;;  %s1801_s4 = inlined_call_operand.hbm [shape: f32[7,8,8], index: 4, kind: input, shape index: {}]   ;;  %s1802_s5 = inlined_call_operand.vmem [shape: f32[3,8], index: 5, kind: input, shape index: {}]   ;;  %s1803_s6 = inlined_call_operand.hbm [shape: f32[3,8], index: 6, kind: input, shape index: {}]   ;;  %s1804_s7 = inlined_call_operand.hbm [shape: f32[16,128], index: 7, kind: output, shape index: {}]  }
   0x1   :  { %1805 = sst [smem:[#allocation13_spill]] %s1800_s3 }
   0x2   :  { %12 = vsyncpa [#allocation4], 0 }
   0x3   :  { %13 = vsyncpa [#allocation7], 0 }
   0x4   :  { %14 = vsyncpa [#allocation5], 0 }
   0x5   :  { %16 = vsyncpa [#allocation5 + $0x1], 0  ;;  %s1543_s24 = smov 0   ;;  %s1545_s25 = smov 0  }
   0x6   :  { %s1547_s26 = smov 0   ;;  %s1549_s27 = smov 0  }
   0x7 LB: > { %s1564_s28 = sadd.s32 4294967295, %s1491_s27   ;;  %s1192_s29 = sadd.s32 4294967294, %s1491_s27   ;;  %s1491_s27 = sphi %s1549_s27, %s1814_s27   ;;  %s1487_s26 = sphi %s1547_s26, %s1813_s26   ;;  %s1483_s25 = sphi %s1545_s25, %s1812_s25   ;;  %s1479_s24 = sphi %s1543_s24, %s1811_s24  }
   0x8   : > { %s1568_s30 = sadd.s32 1, %s1491_s27   ;;  %s181_s8 = sadd.s32 1, %s1487_s26 }
   0x9   : > { %s178_s9 = ssub.s32 %s1491_s27, %s1568_s30  ;;  %p191_p0 = scmp.ne.s32.totalorder %s1487_s26, %s1483_s25 }
   0xa   : > { %p179_p1 = scmp.eq.s32.totalorder %s178_s9, 0  ;;  %p192_p2 = scmp.eq.s32.totalorder %s1564_s28, 1 }
   0xb   : > { %p197_p3 = scmp.ne.s32.totalorder %s1483_s25, %s1479_s24  ;;  %p198_p4 = scmp.eq.s32.totalorder %s1192_s29, 1 }
   0xc   : > { %s1579_s10 = scalar_select %p179_p1, %s1487_s26, %s181_s8  }
   0xd   : > { %p1581_p5 = por %p192_p2, %p191_p0  ;;  %p1585_p6 = por %p198_p4, %p197_p3 }
   0xe   : > { %p1193_p7 = scmp.ge.s32.totalorder %s1491_s27, 1  ;;  %p205_p8 = scmp.lt.s32.totalorder %s1491_s27, 3 }
   0xf   : > { %p1282_p9 = scmp.eq.s32.totalorder %s1564_s28, 0  ;;  %s236_s16 = sshll.u32 %s1801_s4, 4  ;;  %s237_s16 = int_to_ptr.hbm [resolvable:$true] %s236_s16 }
  0x10   : > { %p1592_p10 = pnand %p1193_p7, %p205_p8  ;;  %s1809_s3 = sld [smem:[#allocation13_spill]] }
  0x11   : > { %s1493_s21 = smov [#allocation6]   ;;  %s1494_s23 = smov 128  }
  0x12   : > { %p1268_p11 = pneg %p1592_p10  ;;  %s238_s22 = sshll.u32 %s1493_s21, 4  ;;  %s239_s22 = int_to_ptr.vmem [resolvable:$true] %s238_s22 }
  0x13   : > { %s1495_s29 = smov 8   ;;  %s1496_s8 = smov [#allocation3]  }
  0x14   : > { %p1606_p12 = pnand %p1282_p9, %p1268_p11  ;;  %s224_s9 = sshll.u32 %s1496_s8, 4  ;;  %s225_s9 = int_to_ptr.vmem [resolvable:$true] %s224_s9 }
  0x15   : > { %s254_s17 = sshll.u32 %s1803_s6, 4  ;;  %s1497_s18 = smov [#allocation8]   ;;  %s255_s17 = int_to_ptr.hbm [resolvable:$true] %s254_s17 }
  0x16   : > { %s222_s19 = sshll.u32 %s1809_s3, 4  ;;  %s256_s3 = sshll.u32 %s1497_s18, 4  ;;  %s223_s19 = int_to_ptr.hbm [resolvable:$true] %s222_s19  ;;  %s257_s3 = int_to_ptr.vmem [resolvable:$true] %s256_s3 }
  0x17   : > { %1274 = dma.hbm_to_vmem [thread:$0]  (!%p1606_p12), %s237_s16, 896, %s239_s22, [#allocation7], %s1494_s23, %s1494_s23, %s1495_s29  }
  0x18   : > { %1271 = dma.hbm_to_vmem [thread:$0]  (!%p1606_p12), %s223_s19, 640, %s225_s9, [#allocation4], %s1494_s23, %s1494_s23, %s1495_s29  }
  0x19   : > { %1277 = dma.hbm_to_vmem [thread:$0]  (!%p1606_p12), %s255_s17, 64, %s257_s3, [#allocation7]  }
  0x1a   : > { %278 = sbr.rel (%p1592_p10) target bundleno = 523 (0x20b), region = 48 }
  0x1f   : > { %1466 = dma.done.wait (%p1282_p9), [#allocation4], 640  }
  0x20   : > { %1468 = vsyncadd (%p1282_p9), [#allocation4], 4294966656 }
  0x21   : > { %1470 = dma.done.wait (%p1282_p9), [#allocation7], 960  }
  0x22   : > { %1472 = vsyncadd (%p1282_p9), [#allocation7], 4294966336  ;;  %s1203_s16 = sshll.u32 %s1564_s28, 1  ;;  %vm345_vm0 = vcmask 1043456   ;;  %vm340_vm1 = vcmask 31744   ;;  %vm331_vm2 = vcmask 1040384  }
  0x23   : > { %p322_p13 = scmp.lt.s32.totalorder %s1203_s16, 3  ;;  %v1205_v0 = vld [vmem:[%s1798_s1 + $0x4] sm:$0xf]  ;;  %v1212_v5 = vld [vmem:[%s1798_s1 + $0x8] sm:$0xf]  ;;  %vm403_vm3 = vcmask 1046528  }
  0x24   : > { %1252 = vmatpush.msk.msra.mxu2 %vm345_vm0, %v1205_v0  ;;  %1206 = vmatpush.msk.msra.mxu0 %vm345_vm0, %v1205_v0  ;;  %v337_v6 = vld [vmem:[%s1798_s1] sm:$0xf]  ;;  %v1216_v13 = vld [vmem:[%s1799_s2 + $0x8] sm:$0xff]  ;;  %v588_v14 = vld [vmem:[#allocation3 + $0x8] sm:$0xff]  ;;  %s1499_s21 = smov 8   ;;  %vm480_vm4 = vcmask 64512  }
  0x25   : > { %s1816_s16 = smov (!%p322_p13, %s1203_s16), 3  ;;  %1253 = vmatpush.msk.msra.mxu3 %vm345_vm0, %v337_v6  ;;  %1209 = vmatpush.msk.msra.mxu1 %vm345_vm0, %v337_v6  ;;  %v477_v15 = vld [vmem:[%s1799_s2] sm:$0xff]  ;;  %v581_v16 = vld [vmem:[#allocation3] sm:$0xff]  ;;  %v682_v19 = vld [vmem:[#allocation3 + $0x18] sm:$0xff]  ;;  %s1500_s22 = smov 40   ;;  %vm575_vm5 = vcmask 1041408  }
  0x26   : > { %s1204_s3 = sshll.u32 %s1816_s16, 3  ;;  %1213 = vmatpush.msk.msrb.mxu2 %vm345_vm0, %v1212_v5  ;;  %528 = vmatpush.msrb.mxu0 %v477_v15  ;;  %v1221_v17 = vld [vmem:[%s1799_s2 + $0x10] sm:$0xff]  ;;  %v646_v18 = vld [vmem:[#allocation3 + $0x10] sm:$0xff]  ;;  %v759_v46 = vld [vmem:[#allocation6] sm:$0xff]  ;;  %vm713_vm6 = vcmask 1045504   ;;  %vm753_vm7 = vcmask 1042432  }
  0x27   : > { %s325_s20 = scalar_lea.vmem %s1797_s0, %s1204_s3  ;;  %500 = vmatpush.msrb.mxu3 %v1216_v13  ;;  %563 = vmatpush.msrb.mxu1 %v1221_v17  ;;  %v720_v20 = vld [vmem:[#allocation3 + $0x20] sm:$0xff]  ;;  %v1669_v24 = vld [vmem:[%s1802_s5] sm:$0x7]  ;;  %v829_v61 = vld [vmem:[#allocation6 + $0x10] sm:$0xff]  ;;  %vm965_vm8 = vcmask 1044480   ;;  %s1501_s23 = smov 16  }
  0x28   : > { %v327_v1 = vld [vmem:[%s325_s20] sm:$0xff]  ;;  %v328_v2 = vld [vmem:[%s325_s20 + $0x8] sm:$0xff]  ;;  %v1671_v26 = vld [vmem:[#allocation8] sm:$0x7]  ;;  %v446_v27 = vperm.slane %v1669_v24, 0  ;;  %v454_v28 = vperm.slane %v1669_v24, 1 }
  0x29   : > { %v332_v3 = vrot.slane %v327_v1, 7  ;;  %v333_v4 = vrot.slane %v328_v2, 7  ;;  %1208 = vmatmul.msk.f32.vlgmr.msra.gmra.mxu2 %vm340_vm1, %v328_v2  ;;  %1207 = vmatmul.msk.f32.vlgmr.msra.gmra.mxu0 %vm340_vm1, %v327_v1  ;;  %v404_v7 = vrot.slane %v327_v1, 1  ;;  %v405_v8 = vrot.slane %v328_v2, 1  ;;  %s1498_s20 = smov 24   ;;  %v766_v41 = vld [vmem:[#allocation6 + $0x8] sm:$0xff] }
  0x2a   : > { %609 = vmatpush.msra.mxu2 %v588_v14  ;;  %666 = vmatpush.msra.mxu0 %v646_v18  ;;  %v449_v31 = vperm.slane %v1671_v26, 0  ;;  %v457_v32 = vperm.slane %v1671_v26, 1  ;;  %v861_v47 = vld [vmem:[#allocation6 + $0x18] sm:$0xff]  ;;  %v462_v0 = vperm.slane %v1669_v24, 2  ;;  %v465_v5 = vperm.slane %v1671_v26, 2  ;;  %s1502_s29 = smov 32  }
  0x2b   : > { %v334_v9 = vsel %vm331_vm2, %v332_v3, %v333_v4  ;;  %v336_v10 = vsel %vm331_vm2, 0.0, %v332_v3  ;;  %v406_v11 = vsel %vm403_vm3, %v404_v7, %v405_v8  ;;  %v408_v12 = vsel %vm403_vm3, %v405_v8, 0.0  ;;  %v897_v3 = vld [vmem:[#allocation6 + $0x20] sm:$0xff]  ;;  %s318_s8 = sand.u32 1, %s1483_s25   ;;  %s1249_s14 = sshll.u32 %s1564_s28, 3 }
  0x2c   : > { %1211 = vmatmul.msk.f32.vlgmr.msra.gmra.mxu3 %vm340_vm1, %v334_v9  ;;  %1210 = vmatmul.msk.f32.vlgmr.msra.gmra.mxu1 %vm340_vm1, %v336_v10  ;;  %v934_v9 = vld [vmem:[#allocation6 + $0x28] sm:$0xff]  ;;  %vm1041_vm9 = vcmask 130048   ;;  %vm1044_vm10 = vcmask 195584   ;;  %vm1047_vm11 = vcmask 261120   ;;  %vm1050_vm12 = vcmask 326656   ;;  %s1202_s9 = sshll.u32 %s318_s8, 3  ;;  %s1097_s18 = scalar_lea.hbm %s1804_s7, %s1249_s14 }
  0x2d   : > { %637 = vmatpush.msra.mxu3 %v581_v16  ;;  %703 = vmatpush.msra.mxu1 %v682_v19  ;;  %v972_v19 = vld [vmem:[#allocation6 + $0x30] sm:$0xff]  ;;  %vm1053_vm13 = vcmask 392192   ;;  %s320_s16 = scalar_lea.vmem [#allocation9], %s1202_s9  ;;  %s1101_s13 = sshll.u32 %s1097_s18, 4  ;;  %s1102_s13 = int_to_ptr.hbm [resolvable:$true] %s1101_s13 }
  0x2e   : > { %s1099_s3 = sshll.u32 %s320_s16, 4  ;;  %s1087_s19 = scalar_lea.sflag [#allocation5], %s318_s8  ;;  %s1100_s3 = int_to_ptr.vmem [resolvable:$true] %s1099_s3 }
  0x31   : > { %1214 = vmatmul.msk.f32.vlgmr.msrb.gmra.mxu2 %vm340_vm1, %v406_v11 }
  0x32   : > { %741 = vmatpush.msrb.mxu2 %v720_v20 }
  0x39   : > { %1215 = vmatmul.msk.f32.gmra.mxu2 %vm340_vm1, %v408_v12 }
  0xa6   : > { %v366_v22 = vpop.f32.mrf.mxu0 }
  0xa9   : > { %v397_v23 = vpop.f32.mrf.mxu1 }
  0xaa   : > { %v398_v25 = vadd.f32 %v397_v23, %v366_v22 }
  0xac   : > { %v369_v21 = vpop.f32.mrf.mxu2 }
  0xaf   : > { %v400_v35 = vpop.f32.mrf.mxu3 }
  0xb0   : > { %v401_v38 = vadd.f32 %v400_v35, %v369_v21 }
  0xb4   : > { %v436_v29 = vpop.f32.mrf.mxu2 }
  0xb5   : > { %v442_v30 = vadd.f32 %v436_v29, %v398_v25 }
  0xb7   : > { %1019 = vrot.lane.b32.xlu2 %v442_v30, %s1498_s20  ;;  %1005 = vrot.lane.b32.xlu0 %v442_v30, %s1499_s21  ;;  %v447_v33 = vmul.f32 %v446_v27, %v442_v30  ;;  %v455_v34 = vmul.f32 %v454_v28, %v442_v30  ;;  %v463_v4 = vmul.f32 %v462_v0, %v442_v30 }
  0xb9   : > { %v450_v36 = vadd.f32 %v449_v31, %v447_v33  ;;  %v458_v37 = vadd.f32 %v457_v32, %v455_v34  ;;  %v466_v11 = vadd.f32 %v465_v5, %v463_v4 }
  0xbb   : > { %v452_v39 = vmax.f32 %v450_v36, 0.0  ;;  %v1677_v40 = vmax.f32 %v458_v37, 0.0  ;;  %v468_v15 = vmax.f32 %v466_v11, 0.0 }
  0xbc   : > { %v439_v42 = vpop.f32.mrf.mxu2 }
  0xbd   : > { %v1679_v43 = vadd.f32 %v439_v42, %v401_v38  ;;  %1217 = vmatmul.msk.f32.vlgmr.msrb.gmra.mxu3 %vm480_vm4, %v452_v39  ;;  %v472_v44 = vrot.slane %v452_v39, 7  ;;  %v582_v45 = vrot.slane %v1677_v40, 7  ;;  %v536_v58 = vrot.slane %v452_v39, 1 }
  0xbe   : > { %787 = vmatpush.msrb.mxu3 %v766_v41  ;;  %v576_v1 = vrot.slane %v1677_v40, 6  ;;  %v714_v7 = vrot.slane %v1677_v40, 2  ;;  %v676_v17 = vrot.slane %v1677_v40, 1  ;;  %v760_v22 = vrot.slane %v468_v15, 6 }
  0xbf   : > { %v456_v48 = vmul.f32 %v454_v28, %v1679_v43  ;;  %1021 = vrot.lane.b32.xlu2 %v1679_v43, %s1498_s20  ;;  %1007 = vrot.lane.b32.xlu0 %v1679_v43, %s1499_s21  ;;  %v476_v49 = vsel %vm331_vm2, 0.0, %v472_v44  ;;  %v586_v50 = vsel %vm331_vm2, 0.0, %v582_v45  ;;  %v448_v51 = vmul.f32 %v446_v27, %v1679_v43  ;;  %s1435_s20 = sshra.s32 %s1102_s13, 4  ;;  %s1436_s20 = int_to_ptr.hbm [resolvable:$true] %s1435_s20 }
  0xc0   : > { %1219 = vmatmul.msk.f32.vlgmr.msrb.gmra.mxu0 %vm480_vm4, %v476_v49  ;;  %1224 = vmatmul.msk.f32.vlgmr.msra.gmra.mxu2 %vm480_vm4, %v586_v50  ;;  %v580_v6 = vsel %vm575_vm5, 0.0, %v576_v1  ;;  %v464_v14 = vmul.f32 %v462_v0, %v1679_v43  ;;  %v754_v23 = vrot.slane %v468_v15, 5  ;;  %v764_v25 = vsel %vm575_vm5, 0.0, %v760_v22  ;;  %s1437_s21 = scalar_lea.hbm %s1436_s20, 8  ;;  %p1442_p3 = scmp.lt.s32.totalorder %s1436_s20, %s1804_s7 }
  0xc1   : > { %v459_v52 = vadd.f32 %v457_v32, %v456_v48  ;;  %815 = vmatpush.msrb.mxu0 %v759_v46  ;;  %881 = vmatpush.msra.mxu2 %v861_v47  ;;  %v451_v53 = vadd.f32 %v449_v31, %v448_v51  ;;  %v891_v35 = vrot.slane %v468_v15, 1  ;;  %v928_v39 = vrot.slane %v468_v15, 2  ;;  %p1438_p0 = scmp.ne.s32.totalorder %s1436_s20, %s1437_s21 }
  0xc2   : > { %v467_v21 = vadd.f32 %v465_v5, %v464_v14  ;;  %v758_v27 = vsel %vm753_vm7, 0.0, %v754_v23 }
  0xc3   : > { %v461_v54 = vmax.f32 %v459_v52, 0.0  ;;  %v453_v55 = vmax.f32 %v451_v53, 0.0  ;;  %p1439_p1 = pnand %p1438_p0, %p1581_p5 }
  0xc4   : > { %v469_v24 = vmax.f32 %v467_v21, 0.0 }
  0xc5   : > { %v583_v56 = vrot.slane %v461_v54, 7  ;;  %1218 = vmatmul.msk.f32.gmra.mxu3 %vm480_vm4, %v453_v55  ;;  %v473_v57 = vrot.slane %v453_v55, 7  ;;  %v537_v59 = vrot.slane %v453_v55, 1  ;;  %v715_v2 = vrot.slane %v461_v54, 2  ;;  %p1440_p2 = pneg %p1439_p1 }
  0xc6   : > { %v577_v12 = vrot.slane %v461_v54, 6  ;;  %v677_v13 = vrot.slane %v461_v54, 1  ;;  %v761_v28 = vrot.slane %v469_v24, 6  ;;  %v755_v29 = vrot.slane %v469_v24, 5 }
  0xc7   : > { %1033 = vrot.lane.b32.xlu2 %v442_v30, %s1500_s22  ;;  %v584_v60 = vsel %vm331_vm2, %v582_v45, %v583_v56  ;;  %v474_v62 = vsel %vm331_vm2, %v472_v44, %v473_v57  ;;  %v538_v63 = vsel %vm403_vm3, %v536_v58, %v537_v59  ;;  %v716_v8 = vsel %vm713_vm6, %v714_v7, %v715_v2 }
  0xc8   : > { %1225 = vmatmul.msk.f32.gmra.mxu2 %vm480_vm4, %v584_v60  ;;  %1220 = vmatmul.msk.f32.gmra.mxu0 %vm480_vm4, %v474_v62  ;;  %v540_v10 = vsel %vm403_vm3, %v537_v59, 0.0  ;;  %v578_v16 = vsel %vm575_vm5, %v576_v1, %v577_v12  ;;  %v718_v18 = vsel %vm713_vm6, %v715_v2, 0.0  ;;  %v678_v20 = vsel %vm403_vm3, %v676_v17, %v677_v13 }
  0xc9   : > { %1222 = vmatmul.msk.f32.vlgmr.msrb.gmra.mxu1 %vm480_vm4, %v538_v63  ;;  %v680_v26 = vsel %vm403_vm3, %v677_v13, 0.0  ;;  %v823_v30 = vrot.slane %v468_v15, 7  ;;  %v762_v31 = vsel %vm575_vm5, %v760_v22, %v761_v28  ;;  %v756_v32 = vsel %vm753_vm7, %v754_v23, %v755_v29 }
  0xca   : > { %850 = vmatpush.msrb.mxu1 %v829_v61  ;;  %v892_v34 = vrot.slane %v469_v24, 1  ;;  %v824_v36 = vrot.slane %v469_v24, 7  ;;  %v929_v37 = vrot.slane %v469_v24, 2  ;;  %v967_v42 = vrot.slane %v469_v24, 3 }
  0xcb   : > { %v827_v33 = vsel %vm331_vm2, 0.0, %v823_v30  ;;  %v966_v45 = vrot.slane %v468_v15, 3 }
  0xcc   : > { %v893_v38 = vsel %vm403_vm3, %v891_v35, %v892_v34  ;;  %v930_v41 = vsel %vm713_vm6, %v928_v39, %v929_v37  ;;  %v895_v44 = vsel %vm403_vm3, %v892_v34, 0.0  ;;  %v932_v46 = vsel %vm713_vm6, %v929_v37, 0.0 }
  0xcd   : > { %1226 = vmatmul.msk.f32.vlgmr.msra.gmra.mxu3 %vm480_vm4, %v580_v6  ;;  %v968_v47 = vsel %vm965_vm8, %v966_v45, %v967_v42  ;;  %v970_v48 = vsel %vm965_vm8, %v967_v42, 0.0 }
  0xce   : > { %918 = vmatpush.msra.mxu3 %v897_v3 }
  0xd0   : > { %1232 = vmatmul.msk.f32.vlgmr.msrb.gmra.mxu2 %vm480_vm4, %v716_v8  ;;  %1228 = vmatmul.msk.f32.vlgmr.msra.gmra.mxu0 %vm480_vm4, %v1677_v40  ;;  %v825_v40 = vsel %vm331_vm2, %v823_v30, %v824_v36 }
  0xd1   : > { %1223 = vmatmul.msk.f32.gmra.mxu1 %vm480_vm4, %v540_v10  ;;  %955 = vmatpush.msra.mxu0 %v934_v9 }
  0xd5   : > { %1227 = vmatmul.msk.f32.gmra.mxu3 %vm480_vm4, %v578_v16 }
  0xd8   : > { %1233 = vmatmul.msk.f32.gmra.mxu2 %vm480_vm4, %v718_v18  ;;  %1229 = vmatmul.msk.f32.gmra.mxu0 %vm480_vm4, %v461_v54 }
  0xd9   : > { %1230 = vmatmul.msk.f32.vlgmr.msra.gmra.mxu1 %vm480_vm4, %v678_v20 }
  0xda   : > { %993 = vmatpush.msra.mxu1 %v972_v19 }
  0xdd   : > { %1234 = vmatmul.msk.f32.vlgmr.msrb.gmra.mxu3 %vm480_vm4, %v764_v25 }
  0xe0   : > { %1240 = vmatmul.msk.f32.vlgmr.msra.gmra.mxu2 %vm480_vm4, %v468_v15  ;;  %1236 = vmatmul.msk.f32.vlgmr.msrb.gmra.mxu0 %vm480_vm4, %v758_v27 }
  0xe1   : > { %1231 = vmatmul.msk.f32.gmra.mxu1 %vm480_vm4, %v680_v26 }
  0xe5   : > { %1235 = vmatmul.msk.f32.gmra.mxu3 %vm480_vm4, %v762_v31 }
  0xe8   : > { %1241 = vmatmul.msk.f32.gmra.mxu2 %vm480_vm4, %v469_v24  ;;  %1237 = vmatmul.msk.f32.gmra.mxu0 %vm480_vm4, %v756_v32 }
  0xe9   : > { %1238 = vmatmul.msk.f32.vlgmr.msrb.gmra.mxu1 %vm480_vm4, %v827_v33 }
  0xed   : > { %1242 = vmatmul.msk.f32.vlgmr.msra.gmra.mxu3 %vm480_vm4, %v893_v38 }
  0xf0   : > { %1244 = vmatmul.msk.f32.vlgmr.msra.gmra.mxu0 %vm480_vm4, %v930_v41 }
  0xf1   : > { %1239 = vmatmul.msk.f32.gmra.mxu1 %vm480_vm4, %v825_v40 }
  0xf5   : > { %1243 = vmatmul.msk.f32.gmra.mxu3 %vm480_vm4, %v895_v44 }
  0xf8   : > { %1245 = vmatmul.msk.f32.gmra.mxu0 %vm480_vm4, %v932_v46 }
  0xf9   : > { %1246 = vmatmul.msk.f32.vlgmr.msra.gmra.mxu1 %vm480_vm4, %v968_v47 }
 0x101   : > { %1247 = vmatmul.msk.f32.gmra.mxu1 %vm480_vm4, %v970_v48 }
 0x111   : > { %v1020_v39 = vpop.permute.xlu2 %1019 }
 0x119   : > { %v1022_v42 = vpop.permute.xlu2 %1021 }
 0x129   : > { %v1006_v40 = vpop.permute.xlu0 %1005 }
 0x131   : > { %v1008_v44 = vpop.permute.xlu0 %1007 }
 0x13d   : > { %v530_v49 = vpop.f32.mrf.mxu0 }
 0x140   : > { %v502_v50 = vpop.f32.mrf.mxu3 }
 0x141   : > { %v531_v51 = vadd.f32 %v530_v49, %v502_v50  ;;  %v1034_v50 = vpop.permute.xlu2 %1033 }
 0x143   : > { %v611_v52 = vpop.f32.mrf.mxu2 }
 0x145   : > { %v533_v53 = vpop.f32.mrf.mxu0 }
 0x146   : > { %v565_v54 = vpop.f32.mrf.mxu1 }
 0x147   : > { %v571_v55 = vadd.f32 %v565_v54, %v531_v51 }
 0x148   : > { %v505_v56 = vpop.f32.mrf.mxu3 }
 0x149   : > { %v534_v57 = vadd.f32 %v533_v53, %v505_v56  ;;  %v1039_v45 = vsel %vm480_vm4, %v571_v55, %v1006_v40 }
 0x14b   : > { %v614_v58 = vpop.f32.mrf.mxu2 }
 0x14d   : > { %v668_v60 = vpop.f32.mrf.mxu0 }
 0x14e   : > { %v568_v59 = vpop.f32.mrf.mxu1 }
 0x14f   : > { %v1744_v61 = vadd.f32 %v568_v59, %v534_v57 }
 0x150   : > { %v639_v62 = vpop.f32.mrf.mxu3 }
 0x151   : > { %v640_v63 = vadd.f32 %v639_v62, %v611_v52  ;;  %v1040_v53 = vsel %vm480_vm4, %v1744_v61, %v1008_v44 }
 0x153   : > { %v674_v0 = vadd.f32 %v668_v60, %v640_v63  ;;  %v743_v1 = vpop.f32.mrf.mxu2 }
 0x155   : > { %v671_v2 = vpop.f32.mrf.mxu0 }
 0x156   : > { %v705_v3 = vpop.f32.mrf.mxu1 }
 0x157   : > { %v711_v4 = vadd.f32 %v705_v3, %v674_v0 }
 0x158   : > { %v642_v5 = vpop.f32.mrf.mxu3 }
 0x159   : > { %v749_v6 = vadd.f32 %v743_v1, %v711_v4  ;;  %v643_v7 = vadd.f32 %v642_v5, %v614_v58 }
 0x15b   : > { %1013 = vrot.lane.b32.xlu1 %v749_v6, %s1501_s23  ;;  %v675_v8 = vadd.f32 %v671_v2, %v643_v7  ;;  %v746_v12 = vpop.f32.mrf.mxu2 }
 0x15d   : > { %v817_v10 = vpop.f32.mrf.mxu0 }
 0x15e   : > { %v708_v9 = vpop.f32.mrf.mxu1 }
 0x15f   : > { %v712_v11 = vadd.f32 %v708_v9, %v675_v8 }
 0x160   : > { %v789_v14 = vpop.f32.mrf.mxu3 }
 0x161   : > { %v750_v13 = vadd.f32 %v746_v12, %v712_v11  ;;  %v818_v18 = vadd.f32 %v817_v10, %v789_v14 }
 0x163   : > { %1015 = vrot.lane.b32.xlu1 %v750_v13, %s1501_s23  ;;  %v883_v20 = vpop.f32.mrf.mxu2  ;;  %s1441_s23 = scalar_lea.hbm %s1804_s7, 16 }
 0x164   : > { %p1443_p4 = scmp.lt.s32.totalorder %s1441_s23, %s1437_s21 }
 0x165   : > { %v820_v16 = vpop.f32.mrf.mxu0 }
 0x166   : > { %v852_v15 = vpop.f32.mrf.mxu1  ;;  %p1444_p7 = por %p1443_p4, %p1442_p3 }
 0x167   : > { %v858_v19 = vadd.f32 %v852_v15, %v818_v18 }
 0x168   : > { %v792_v17 = vpop.f32.mrf.mxu3  ;;  %p1445_p8 = pnand %p1444_p7, %p1440_p2 }
 0x169   : > { %v889_v22 = vadd.f32 %v883_v20, %v858_v19  ;;  %v821_v25 = vadd.f32 %v820_v16, %v792_v17 }
 0x16b   : > { %v886_v30 = vpop.f32.mrf.mxu2 }
 0x16d   : > { %v957_v23 = vpop.f32.mrf.mxu0 }
 0x16e   : > { %v855_v21 = vpop.f32.mrf.mxu1 }
 0x16f   : > { %v859_v27 = vadd.f32 %v855_v21, %v821_v25 }
 0x170   : > { %v920_v24 = vpop.f32.mrf.mxu3 }
 0x171   : > { %v926_v26 = vadd.f32 %v920_v24, %v889_v22  ;;  %v890_v32 = vadd.f32 %v886_v30, %v859_v27 }
 0x173   : > { %v963_v28 = vadd.f32 %v957_v23, %v926_v26 }
 0x175   : > { %v960_v35 = vpop.f32.mrf.mxu0 }
 0x176   : > { %v995_v29 = vpop.f32.mrf.mxu1 }
 0x177   : > { %v1001_v31 = vadd.f32 %v995_v29, %v963_v28 }
 0x178   : > { %v923_v33 = vpop.f32.mrf.mxu3 }
 0x179   : > { %1027 = vrot.lane.b32.xlu0 %v1001_v31, %s1502_s29  ;;  %v927_v34 = vadd.f32 %v923_v33, %v890_v32 }
 0x17b   : > { %v964_v36 = vadd.f32 %v960_v35, %v927_v34 }
 0x17e   : > { %v998_v37 = vpop.f32.mrf.mxu1 }
 0x17f   : > { %v1002_v38 = vadd.f32 %v998_v37, %v964_v36 }
 0x181   : > { %1035 = vrot.lane.b32.xlu0 %v1679_v43, %s1500_s22  ;;  %1029 = vrot.lane.b32.xlu1 %v1002_v38, %s1502_s29 }
 0x1cd   : > { %v1014_v41 = vpop.permute.xlu1 %1013 }
 0x1ce   : > { %v1042_v46 = vsel %vm1041_vm9, %v1039_v45, %v1014_v41 }
 0x1cf   : > { %v1045_v48 = vsel %vm1044_vm10, %v1042_v46, %v1020_v39 }
 0x1d5   : > { %v1016_v47 = vpop.permute.xlu1 %1015 }
 0x1d6   : > { %v1043_v54 = vsel %vm1041_vm9, %v1040_v53, %v1016_v47 }
 0x1d7   : > { %v1046_v58 = vsel %vm1044_vm10, %v1043_v54, %v1022_v42 }
 0x1eb   : > { %v1028_v49 = vpop.permute.xlu0 %1027 }
 0x1ec   : > { %v1048_v43 = vsel %vm1047_vm11, %v1045_v48, %v1028_v49 }
 0x1ed   : > { %v1051_v51 = vsel %vm1050_vm12, %v1048_v43, %v1034_v50 }
 0x1ee   : > { %v1054_v52 = vsel %vm1053_vm13, %v1051_v51, 0.0 }
 0x1ef   : > { %v1058_v55 = vrot.slane %v1054_v52, 7  ;;  %v1066_v63 = vrot.slane %v1054_v52, 1  ;;  %v1074_v1 = vrot.slane %v1054_v52, 2 }
 0x1f1   : > { %v1063_v60 = vsel %vm331_vm2, -inf, %v1058_v55 }
 0x1f2   : > { %v1064_v4 = vmax.f32 %v1054_v52, %v1063_v60 }
 0x1f3   : > { %v1036_v56 = vpop.permute.xlu0 %1035  ;;  %v1030_v57 = vpop.permute.xlu1 %1029 }
 0x1f4   : > { %v1049_v59 = vsel %vm1047_vm11, %v1046_v58, %v1030_v57 }
 0x1f5   : > { %v1052_v62 = vsel %vm1050_vm12, %v1049_v59, %v1036_v56 }
 0x1f6   : > { %v1055_v0 = vsel %vm1053_vm13, %v1052_v62, 0.0 }
 0x1f7   : > { %v1059_v2 = vrot.slane %v1055_v0, 7  ;;  %v1067_v61 = vrot.slane %v1055_v0, 1  ;;  %v1075_v3 = vrot.slane %v1055_v0, 2 }
 0x1f9   : > { %v1060_v5 = vsel %vm331_vm2, %v1058_v55, %v1059_v2  ;;  %v1068_v6 = vsel %vm403_vm3, %v1066_v63, %v1067_v61  ;;  %v1076_v7 = vsel %vm713_vm6, %v1074_v1, %v1075_v3  ;;  %v1071_v10 = vsel %vm403_vm3, %v1067_v61, -inf }
 0x1fa   : > { %v1065_v8 = vmax.f32 %v1055_v0, %v1060_v5  ;;  %v1072_v9 = vmax.f32 %v1064_v4, %v1068_v6  ;;  %v1079_v13 = vsel %vm713_vm6, %v1075_v3, -inf }
 0x1fc   : > { %v1073_v11 = vmax.f32 %v1065_v8, %v1071_v10  ;;  %v1080_v12 = vmax.f32 %v1072_v9, %v1076_v7 }
 0x1fe   : > { %v1081_v14 = vmax.f32 %v1073_v11, %v1079_v13  ;;  %1082 = vst [vmem:[#allocation2] sm:$0xff] %v1080_v12 }
 0x200   : > { %1083 = vst [vmem:[#allocation2 + $0x8] sm:$0xff] %v1081_v14 }
 0x207   : > { %v1084_v15 = vld [vmem:[#allocation2] ss:$2 sm:$0xff] }
 0x208   : > { %1085 = vst [vmem:[%s320_s16] sm:$0xff] %v1084_v15 }
 0x209   : > { %1448 = shalt.err (!%p1445_p8)
}
 0x20a   : > { %1266 = dma.vmem_to_hbm [thread:$0]  (%p1581_p5), %s1100_s3, 128, %s1102_s13, %s1087_s19  }
 0x20b PF: > { %p1288_p9 = scmp.ge.s32.totalorder %s1491_s27, 2  ;;  %s1113_s8 = sand.u32 1, %s1479_s24  }
 0x20c   : > { %s1114_s14 = scalar_lea.sflag [#allocation5], %s1113_s8 }
 0x20d   : > { %p1279_p10 = pnand %p1288_p9, %p1585_p6 }
 0x20f   : > { %p1280_p11 = pneg %p1279_p10 }
 0x211   : > { %1474 = dma.done.wait (%p1280_p11), %s1114_s14, 128  }
 0x212   : > { %1476 = vsyncadd (%p1280_p11), %s1114_s14, 4294967168  ;;  %p19_p12 = scmp.ge.s32.totalorder %s1568_s30, 4   ;;  %s1811_s24 = smov %s1483_s25 }
 0x213   : > { %s1812_s25 = smov %s1487_s26  ;;  %s1813_s26 = smov %s1579_s10 }
 0x214   : > { %s1814_s27 = smov %s1568_s30  ;;  %21 = sbr.rel (!%p19_p12) target bundleno = 7 (0x7), region = 110 }
 0x219   :  { %1120 = vsyncpa [#allocation4], 1 }
 0x21a   :  { %1122 = vsyncpa [#allocation4 + $0x1], 1 }
 0x21b   :  { %1123 = vsyncpa [#allocation7], 1 }
 0x21c   :  { %1124 = vsyncpa [#allocation5], 1 }
 0x21d   :  { %1126 = vsyncpa [#allocation5 + $0x1], 1 }

</bundles_post_ra>
